<compile_context>
chip_gen: v7x
topology: tpu7x:2x2x1
jax: 0.10.0
libtpu: 0.0.40
codegen_flags: <defaults>
</compile_context>

<pallas_src>
import math
import functools

import jax
import jax.numpy as jnp
from jax import lax
from jax.experimental import pallas as pl
from jax.experimental.pallas import tpu as pltpu

_LANE = 128       # lane width (last-dim tiling unit)
_SUBLANE = 8      # f32 sublane width (second-to-last-dim tiling unit)
_INV_SQRT2 = 1.0 / math.sqrt(2.0)
_GELU_C = math.sqrt(2.0 / math.pi)


def _round_up(x, m):
    return (x + m - 1) // m * m


def _mlp_kernel(x_ref, w1_ref, b1_ref, w2_ref, b2_ref, o_ref, *,
                eps, n_hidden, approximate_gelu):
    """Linear -> GELU -> LayerNorm(core) -> Linear(affine-folded) for one row tile."""
    # ---- Linear 1 : cast x tile to MXU dtype in-kernel, f32 accumulate ----
    xt = x_ref[...].astype(w1_ref.dtype)
    h = jnp.dot(xt, w1_ref[...], preferred_element_type=jnp.float32) + b1_ref[...]

    # ---- GELU ----
    if approximate_gelu:
        # tanh form -> EUP slot (VALU stays free for everything else).
        h = 0.5 * h * (1.0 + jnp.tanh(_GELU_C * (h + 0.044715 * h * h * h)))
    else:
        # exact erf form == torch.nn.GELU() default (VPU polynomial).
        h = 0.5 * h * (1.0 + lax.erf(h * _INV_SQRT2))

    # ---- LayerNorm statistics over the true hidden dim (padded cols are 0) ----
    inv_n = 1.0 / float(n_hidden)
    mu = jnp.sum(h, axis=-1, keepdims=True) * inv_n
    ex2 = jnp.sum(h * h, axis=-1, keepdims=True) * inv_n
    var = jnp.maximum(ex2 - mu * mu, 0.0)
    rstd = lax.rsqrt(var + eps)
    # gamma/beta are folded into W2'/b2' in the wrapper; padded hidden rows of
    # W2' are zero, so the nonzero (-mu*rstd) in padded columns contributes 0.
    hn = (h - mu) * rstd

    # ---- Linear 2 (LN affine folded in), f32 accumulate ----
    y = jnp.dot(hn.astype(w2_ref.dtype), w2_ref[...],
                preferred_element_type=jnp.float32) + b2_ref[...]
    o_ref[...] = y.astype(o_ref.dtype)


def prepare_params(params, *, mxu_dtype=jnp.bfloat16):
    """One-time weight prep: LN-affine fold, 128-lane zero padding, MXU casts.

    Call this once per weight set and pass the result to image_proj_model_g to
    keep weight pad/cast passes off the per-call critical path.
    """
    w1 = jnp.asarray(params["w1"], jnp.float32)
    b1 = jnp.asarray(params["b1"], jnp.float32)
    gamma = jnp.asarray(params["gamma"], jnp.float32)
    beta = jnp.asarray(params["beta"], jnp.float32)
    w2 = jnp.asarray(params["w2"], jnp.float32)
    b2 = jnp.asarray(params["b2"], jnp.float32)

    in_dim, hidden_dim = w1.shape
    out_dim = w2.shape[1]
    in_p = _round_up(in_dim, _LANE)
    hid_p = _round_up(hidden_dim, _LANE)
    out_p = _round_up(out_dim, _LANE)

    # Fold LayerNorm affine into the second linear layer (exact algebra, f32).
    w2_folded = gamma[:, None] * w2
    b2_folded = beta @ w2 + b2

    w1_p = jnp.pad(w1, ((0, in_p - in_dim), (0, hid_p - hidden_dim))).astype(mxu_dtype)
    w2_p = jnp.pad(w2_folded, ((0, hid_p - hidden_dim), (0, out_p - out_dim))).astype(mxu_dtype)
    b1_p = jnp.pad(b1, (0, hid_p - hidden_dim)).reshape(1, hid_p).astype(jnp.float32)
    b2_p = jnp.pad(b2_folded, (0, out_p - out_dim)).reshape(1, out_p).astype(jnp.float32)

    return {
        "_prepared": True,
        "w1": w1_p, "b1": b1_p, "w2": w2_p, "b2": b2_p,
        "in_dim": in_dim, "hidden_dim": hidden_dim, "out_dim": out_dim,
        "in_p": in_p, "hid_p": hid_p, "out_p": out_p,
    }


def image_proj_model_g(x, params, *, eps=1e-5, tm=None,
                       mxu_dtype=jnp.bfloat16, approximate_gelu=True):
    """x: (..., in_dim) -> (..., out_dim); fused MLP in one Pallas kernel."""
    prepared = params if isinstance(params, dict) and params.get("_prepared", False) \
        else prepare_params(params, mxu_dtype=mxu_dtype)

    w1_p, b1_p, w2_p, b2_p = prepared["w1"], prepared["b1"], prepared["w2"], prepared["b2"]
    in_dim, hidden_dim, out_dim = prepared["in_dim"], prepared["hidden_dim"], prepared["out_dim"]
    in_p, hid_p, out_p = prepared["in_p"], prepared["hid_p"], prepared["out_p"]

    lead = x.shape[:-1]
    rows = math.prod(lead) if lead else 1
    assert x.shape[-1] == in_dim

    # Row-tile heuristic: small f32 intermediates for large hidden dims, and
    # >= 2 parallel grid steps whenever there are enough rows (megacore/2-TC).
    if tm is None:
        tm = 128 if hid_p >= 4096 else 256
        if rows > _SUBLANE:
            tm = min(tm, _round_up(-(-rows // 2), _SUBLANE))
        else:
            tm = _SUBLANE
    tm = max(_SUBLANE, _round_up(tm, _SUBLANE))
    rows_p = _round_up(rows, tm)
    grid = (rows_p // tm,)

    # x stays in its original dtype (cast to MXU dtype in-kernel); pad only
    # when the shape actually requires it.
    x2 = x.reshape(rows, in_dim)
    if rows_p != rows or in_p != in_dim:
        x2 = jnp.pad(x2, ((0, rows_p - rows), (0, in_p - in_dim)))

    w_itm = jnp.dtype(w1_p.dtype).itemsize
    x_itm = jnp.dtype(x2.dtype).itemsize
    o_itm = jnp.dtype(x.dtype).itemsize

    # VMEM budget: single-buffered resident weights/biases, double-buffered
    # x/out tiles, ~3 f32 (tm, hid_p) intermediates; 2x headroom, capped at
    # 75% of the chip's per-core VMEM (v7x only has 64 MiB per TensorCore).
    # TODO(synk): add a hid_p/out_p-tiled fallback grid axis for hidden dims so
    # large that resident weights + intermediates exceed the VMEM budget.
    try:
        vmem_capacity = int(pltpu.get_tpu_info().vmem_capacity_bytes)
    except Exception:
        vmem_capacity = 64 * 1024 * 1024
    vmem_cap = int(0.75 * vmem_capacity)
    vmem_est = ((w1_p.size + w2_p.size) * w_itm
                + (b1_p.size + b2_p.size) * 4
                + 2 * tm * in_p * x_itm
                + 2 * tm * out_p * o_itm
                + 3 * tm * hid_p * 4)
    vmem_limit = int(min(max(2 * vmem_est, 16 * 1024 * 1024), vmem_cap))

    cost = pl.CostEstimate(
        flops=int(2 * rows_p * (in_p * hid_p + hid_p * out_p)),
        transcendentals=int(rows_p * hid_p),
        bytes_accessed=int(x2.size * x_itm
                           + (w1_p.size + w2_p.size) * w_itm
                           + (b1_p.size + b2_p.size) * 4
                           + rows_p * out_p * o_itm),
    )

    resident = dict(pipeline_mode=pl.Buffered(1))   # grid-constant operands

    out = pl.pallas_call(
        functools.partial(_mlp_kernel, eps=eps, n_hidden=hidden_dim,
                          approximate_gelu=approximate_gelu),
        out_shape=jax.ShapeDtypeStruct((rows_p, out_p), x.dtype),
        grid_spec=pltpu.PrefetchScalarGridSpec(
            num_scalar_prefetch=0,
            grid=grid,
            in_specs=[
                pl.BlockSpec((tm, in_p), lambda i: (i, 0)),                  # x tile (pipelined)
                pl.BlockSpec((in_p, hid_p), lambda i: (0, 0), **resident),   # W1
                pl.BlockSpec((1, hid_p), lambda i: (0, 0), **resident),      # b1
                pl.BlockSpec((hid_p, out_p), lambda i: (0, 0), **resident),  # W2' (gamma folded)
                pl.BlockSpec((1, out_p), lambda i: (0, 0), **resident),      # b2' (beta folded)
            ],
            out_specs=pl.BlockSpec((tm, out_p), lambda i: (i, 0)),
        ),
        compiler_params=pltpu.CompilerParams(
            dimension_semantics=("parallel",),
            vmem_limit_bytes=vmem_limit),
        cost_estimate=cost,
    )(x2, w1_p, b1_p, w2_p, b2_p)

    return out[:rows, :out_dim].reshape(*lead, out_dim)


def init_params(key, in_dim, hidden_dim, out_dim):
    """Deterministic synthetic parameters (shapes match the PyTorch module)."""
    k1, k2, k3, k4 = jax.random.split(key, 4)
    s1 = 1.0 / math.sqrt(in_dim)
    s2 = 1.0 / math.sqrt(hidden_dim)
    return {
        # stored as (in, out) so the kernel does x @ W  (== PyTorch x @ W.T)
        "w1": jax.random.uniform(k1, (in_dim, hidden_dim), jnp.float32, -s1, s1),
        "b1": jax.random.uniform(k2, (hidden_dim,), jnp.float32, -s1, s1),
        "gamma": jnp.ones((hidden_dim,), jnp.float32),
        "beta": jnp.zeros((hidden_dim,), jnp.float32),
        "w2": jax.random.uniform(k3, (hidden_dim, out_dim), jnp.float32, -s2, s2),
        "b2": jax.random.uniform(k4, (out_dim,), jnp.float32, -s2, s2),
    }


def _reference(x, p, eps=1e-5):
    """Pure-JAX f32 reference of the PyTorch forward (exact-erf GELU)."""
    h = x @ p["w1"] + p["b1"]
    h = 0.5 * h * (1.0 + lax.erf(h / math.sqrt(2.0)))
    mu = jnp.mean(h, axis=-1, keepdims=True)
    var = jnp.mean((h - mu) ** 2, axis=-1, keepdims=True)
    hn = (h - mu) / jnp.sqrt(var + eps)
    hn = hn * p["gamma"] + p["beta"]
    return hn @ p["w2"] + p["b2"]


if __name__ == "__main__":
    key = jax.random.PRNGKey(0)
    kx, kp = jax.random.split(key)

    batch, seq = 2, 8
    in_dim, hidden_dim, out_dim = 32, 64, 32

    x = jax.random.normal(kx, (batch, seq, in_dim), dtype=jnp.float32)
    params = init_params(kp, in_dim, hidden_dim, out_dim)

    # One-time weight prep (hoisted off the per-call path), then the kernel.
    prepared = jax.tree_util.tree_map(lambda a: a, prepare_params(params))
    y = jax.block_until_ready(image_proj_model_g(x, prepared))
    y_ref = _reference(x, params)

    assert y.shape == (batch, seq, out_dim)
    # bf16 MXU operands + tanh-approx GELU vs f32 exact-erf reference.
    assert jnp.allclose(y, y_ref, atol=5e-2, rtol=5e-2), "mismatch vs reference"

    print("KERNEL_OK")
</pallas_src>

<mosaic_0001>
module attributes {stable_mosaic.version = 11 : i64} {
  func.func @_mlp_kernel(%arg0: i32, %arg1: memref<8x128xf32, #tpu.memory_space<vmem>>, %arg2: memref<128x128xbf16, #tpu.memory_space<vmem>>, %arg3: memref<1x128xf32, #tpu.memory_space<vmem>>, %arg4: memref<128x128xbf16, #tpu.memory_space<vmem>>, %arg5: memref<1x128xf32, #tpu.memory_space<vmem>>, %arg6: memref<8x128xf32, #tpu.memory_space<vmem>>) attributes {dimension_semantics = [#tpu.dimension_semantics<parallel>], iteration_bounds = array<i64: 2>, scalar_prefetch = 0 : i64, scratch_operands = 0 : i64, tpu.core_type = #tpu.core_type<tc>, window_params = [{transform_indices = @transform_0, window_bounds = array<i64: 8, 128>}, {pipeline_mode = #tpu.pipeline_mode<synchronous>, transform_indices = @transform_1, window_bounds = array<i64: 128, 128>}, {pipeline_mode = #tpu.pipeline_mode<synchronous>, transform_indices = @transform_2, window_bounds = array<i64: 1, 128>}, {pipeline_mode = #tpu.pipeline_mode<synchronous>, transform_indices = @transform_3, window_bounds = array<i64: 128, 128>}, {pipeline_mode = #tpu.pipeline_mode<synchronous>, transform_indices = @transform_4, window_bounds = array<i64: 1, 128>}, {transform_indices = @transform_5, window_bounds = array<i64: 8, 128>}]} {
    %c0 = arith.constant 0 : index
    %c0_0 = arith.constant 0 : index
    %0 = vector.load %arg1[%c0, %c0_0] : memref<8x128xf32, #tpu.memory_space<vmem>>, vector<8x128xf32>
    %1 = arith.truncf %0 : vector<8x128xf32> to vector<8x128xbf16>
    %c0_1 = arith.constant 0 : index
    %c0_2 = arith.constant 0 : index
    %2 = vector.load %arg2[%c0_1, %c0_2] : memref<128x128xbf16, #tpu.memory_space<vmem>>, vector<128x128xbf16>
    %cst = arith.constant dense<0.000000e+00> : vector<8x128xf32>
    %3 = tpu.matmul %1, %2, %cst {dimension_numbers = #tpu.dot_dimension_numbers<[1], [0], [0], [1], [0, 0, 1, 1], [], []>} : vector<8x128xbf16>, vector<128x128xbf16>, vector<8x128xf32> -> vector<8x128xf32>
    %c0_3 = arith.constant 0 : index
    %c0_4 = arith.constant 0 : index
    %4 = vector.load %arg3[%c0_3, %c0_4] : memref<1x128xf32, #tpu.memory_space<vmem>>, vector<1x128xf32>
    %5 = vector.broadcast %4 : vector<1x128xf32> to vector<8x128xf32>
    %6 = arith.addf %3, %5 : vector<8x128xf32>
    %cst_5 = arith.constant 5.000000e-01 : f32
    %7 = vector.broadcast %cst_5 : f32 to vector<8x128xf32>
    %8 = arith.mulf %7, %6 : vector<8x128xf32>
    %cst_6 = arith.constant 4.471500e-02 : f32
    %9 = vector.broadcast %cst_6 : f32 to vector<8x128xf32>
    %10 = arith.mulf %9, %6 : vector<8x128xf32>
    %11 = arith.mulf %10, %6 : vector<8x128xf32>
    %12 = arith.mulf %11, %6 : vector<8x128xf32>
    %13 = arith.addf %6, %12 : vector<8x128xf32>
    %cst_7 = arith.constant 0.797884583 : f32
    %14 = vector.broadcast %cst_7 : f32 to vector<8x128xf32>
    %15 = arith.mulf %14, %13 : vector<8x128xf32>
    %16 = math.tanh %15 : vector<8x128xf32>
    %cst_8 = arith.constant 1.000000e+00 : f32
    %17 = vector.broadcast %cst_8 : f32 to vector<8x128xf32>
    %18 = arith.addf %17, %16 : vector<8x128xf32>
    %19 = arith.mulf %8, %18 : vector<8x128xf32>
    %cst_9 = arith.constant dense<0.000000e+00> : vector<8xf32>
    %20 = vector.multi_reduction <add>, %19, %cst_9 [1] : vector<8x128xf32> to vector<8xf32>
    %21 = vector.shape_cast %20 : vector<8xf32> to vector<8x1xf32>
    %cst_10 = arith.constant 1.562500e-02 : f32
    %22 = vector.broadcast %cst_10 : f32 to vector<8x1xf32>
    %23 = arith.mulf %21, %22 : vector<8x1xf32>
    %24 = arith.mulf %19, %19 : vector<8x128xf32>
    %cst_11 = arith.constant dense<0.000000e+00> : vector<8xf32>
    %25 = vector.multi_reduction <add>, %24, %cst_11 [1] : vector<8x128xf32> to vector<8xf32>
    %26 = vector.shape_cast %25 : vector<8xf32> to vector<8x1xf32>
    %cst_12 = arith.constant 1.562500e-02 : f32
    %27 = vector.broadcast %cst_12 : f32 to vector<8x1xf32>
    %28 = arith.mulf %26, %27 : vector<8x1xf32>
    %29 = arith.mulf %23, %23 : vector<8x1xf32>
    %30 = arith.subf %28, %29 : vector<8x1xf32>
    %cst_13 = arith.constant 0.000000e+00 : f32
    %31 = vector.broadcast %cst_13 : f32 to vector<8x1xf32>
    %32 = arith.maximumf %30, %31 : vector<8x1xf32>
    %cst_14 = arith.constant 9.99999974E-6 : f32
    %33 = vector.broadcast %cst_14 : f32 to vector<8x1xf32>
    %34 = arith.addf %32, %33 : vector<8x1xf32>
    %35 = math.rsqrt %34 : vector<8x1xf32>
    %36 = vector.broadcast %23 : vector<8x1xf32> to vector<8x128xf32>
    %37 = arith.subf %19, %36 : vector<8x128xf32>
    %38 = vector.broadcast %35 : vector<8x1xf32> to vector<8x128xf32>
    %39 = arith.mulf %37, %38 : vector<8x128xf32>
    %40 = arith.truncf %39 : vector<8x128xf32> to vector<8x128xbf16>
    %c0_15 = arith.constant 0 : index
    %c0_16 = arith.constant 0 : index
    %41 = vector.load %arg4[%c0_15, %c0_16] : memref<128x128xbf16, #tpu.memory_space<vmem>>, vector<128x128xbf16>
    %cst_17 = arith.constant dense<0.000000e+00> : vector<8x128xf32>
    %42 = tpu.matmul %40, %41, %cst_17 {dimension_numbers = #tpu.dot_dimension_numbers<[1], [0], [0], [1], [0, 0, 1, 1], [], []>} : vector<8x128xbf16>, vector<128x128xbf16>, vector<8x128xf32> -> vector<8x128xf32>
    %c0_18 = arith.constant 0 : index
    %c0_19 = arith.constant 0 : index
    %43 = vector.load %arg5[%c0_18, %c0_19] : memref<1x128xf32, #tpu.memory_space<vmem>>, vector<1x128xf32>
    %44 = vector.broadcast %43 : vector<1x128xf32> to vector<8x128xf32>
    %45 = arith.addf %42, %44 : vector<8x128xf32>
    %c0_20 = arith.constant 0 : index
    %c0_21 = arith.constant 0 : index
    %46 = vector.load %arg6[%c0_20, %c0_21] : memref<8x128xf32, #tpu.memory_space<vmem>>, vector<8x128xf32>
    tpu.vector_store %arg6[%c0_20, %c0_21], %45 {strides = array<i32>} : memref<8x128xf32, #tpu.memory_space<vmem>>, vector<8x128xf32>,
    return
  }
  func.func @transform_0(%arg0: i32) -> (i32, i32) {
    %c0_i32 = arith.constant 0 : i32
    %c0_i32_0 = arith.constant 0 : i32
    return %arg0, %c0_i32 : i32, i32
  }
  func.func @transform_1(%arg0: i32) -> (i32, i32) {
    %c0_i32 = arith.constant 0 : i32
    %c0_i32_0 = arith.constant 0 : i32
    %c0_i32_1 = arith.constant 0 : i32
    return %c0_i32, %c0_i32_0 : i32, i32
  }
  func.func @transform_2(%arg0: i32) -> (i32, i32) {
    %c0_i32 = arith.constant 0 : i32
    %c0_i32_0 = arith.constant 0 : i32
    %c0_i32_1 = arith.constant 0 : i32
    return %c0_i32, %c0_i32_0 : i32, i32
  }
  func.func @transform_3(%arg0: i32) -> (i32, i32) {
    %c0_i32 = arith.constant 0 : i32
    %c0_i32_0 = arith.constant 0 : i32
    %c0_i32_1 = arith.constant 0 : i32
    return %c0_i32, %c0_i32_0 : i32, i32
  }
  func.func @transform_4(%arg0: i32) -> (i32, i32) {
    %c0_i32 = arith.constant 0 : i32
    %c0_i32_0 = arith.constant 0 : i32
    %c0_i32_1 = arith.constant 0 : i32
    return %c0_i32, %c0_i32_0 : i32, i32
  }
  func.func @transform_5(%arg0: i32) -> (i32, i32) {
    %c0_i32 = arith.constant 0 : i32
    %c0_i32_0 = arith.constant 0 : i32
    return %arg0, %c0_i32 : i32, i32
  }
}

</mosaic_0001>

<bundles_post_ra>
// kernel: tpu_custom_call.1
= control target key start
LH: loop header
LB: loop body
LE: loop exit
PB: predicated region body
PF: predicated region fallthrough
CT: control target
= control target key end

     0   :  { %10 = vsyncpa [#allocation3], 0  ;;  %s1261_s0 = inlined_call_operand.hbm [shape: f32[16,128], index: 0, kind: input, shape index: {}]   ;;  %s1262_s1 = inlined_call_operand.hbm [shape: bf16[128,128], index: 1, kind: input, shape index: {}]   ;;  %s1263_s2 = inlined_call_operand.vmem [shape: f32[1,128], index: 2, kind: input, shape index: {}]   ;;  %s1264_s3 = inlined_call_operand.hbm [shape: bf16[128,128], index: 3, kind: input, shape index: {}]   ;;  %s1265_s4 = inlined_call_operand.vmem [shape: f32[1,128], index: 4, kind: input, shape index: {}]   ;;  %s1266_s5 = inlined_call_operand.hbm [shape: f32[16,128], index: 5, kind: output, shape index: {}]  }
   0x1   :  { %12 = vsyncpa [#allocation3 + $0x1], 0 }
   0x2   :  { %13 = vsyncpa [#allocation6], 0 }
   0x3   :  { %14 = vsyncpa [#allocation4], 0 }
   0x4   :  { %16 = vsyncpa [#allocation4 + $0x1], 0  ;;  %s1001_s18 = smov 0   ;;  %s1003_s19 = smov 0  }
   0x5   :  { %s1005_s20 = smov 0   ;;  %s1007_s21 = smov 0  }
   0x6 LB: > { %s1022_s22 = sadd.s32 4294967295, %s961_s21   ;;  %s622_s23 = sadd.s32 4294967294, %s961_s21   ;;  %s961_s21 = sphi %s1007_s21, %s1286_s21   ;;  %s957_s20 = sphi %s1005_s20, %s1285_s20   ;;  %s953_s19 = sphi %s1003_s19, %s1284_s19   ;;  %s949_s18 = sphi %s1001_s18, %s1283_s18  }
   0x7   : > { %p42_p0 = scmp.ne.s32.totalorder %s953_s19, %s949_s18  ;;  %p1267_p1 = scmp.eq.s32.totalorder %s1022_s22, 0 }
   0x8   : > { %p156_p3 = scmp.eq.s32.totalorder %s622_s23, 1  ;;  %p623_p5 = scmp.ge.s32.totalorder %s961_s21, 1 }
   0x9   : > { %p1031_p4 = por %p1267_p1, %p42_p0  ;;  %p163_p7 = scmp.lt.s32.totalorder %s961_s21, 3 }
   0xa   : > { %p1036_p6 = por %p156_p3, %p42_p0  ;;  %s963_s27 = smov [#allocation5]  }
   0xb   : > { %s1270_s24 = scalar_select %p1031_p4, 1, 0 }
   0xc   : > { %s1271_s25 = scalar_select %p1036_p6, 1, 0 }
   0xd   : > { %p1041_p8 = pnand %p623_p5, %p163_p7  ;;  %s175_s28 = sshll.u32 %s963_s27, 4  ;;  %s1045_s28 = int_to_ptr.vmem [resolvable:$true] %s175_s28 }
   0xe   : > { %s964_s30 = smov [#allocation7]   ;;  %s805_s9 = scalar_lea.hbm %s1262_s1, 1024 }
   0xf   : > { %p726_p9 = pneg %p1041_p8  ;;  %s191_s6 = sshll.u32 %s964_s30, 4  ;;  %s1056_s6 = int_to_ptr.vmem [resolvable:$true] %s191_s6 }
  0x10   : > { %p806_p12 = scmp.ne.s32.totalorder %s1262_s1, %s805_s9  ;;  %p812_p5 = scmp.lt.u32.totalorder %s805_s9, %s1262_s1 }
  0x11   : > { %p1052_p11 = pnand %p726_p9, %p1267_p1 }
  0x13   : > { %p807_p13 = pneg %p1052_p11 }
  0x15   : > { %p808_p0 = pnand %p807_p13, %p806_p12 }
  0x17   : > { %p809_p3 = pneg %p808_p0 }
  0x19   : > { %p814_p7 = pnand %p812_p5, %p809_p3 }
  0x1b   : > { %817 = shalt.err (!%p814_p7)
}
  0x1c   : > { %s818_s14 = scalar_lea.vmem %s1045_s28, 1024  ;;  %p826_p2 = scmp.lt.s32.totalorder %s1045_s28, %s1045_s28 }
  0x1d   : > { %p819_p9 = scmp.ne.s32.totalorder %s1045_s28, %s818_s14  ;;  %p827_p12 = scmp.lt.s32.totalorder %s818_s14, %s818_s14 }
  0x1f   : > { %p821_p10 = pnand %p819_p9, %p807_p13  ;;  %p828_p0 = por %p827_p12, %p826_p2 }
  0x21   : > { %p822_p1 = pneg %p821_p10 }
  0x23   : > { %p829_p6 = pnand %p828_p0, %p822_p1 }
  0x25   : > { %832 = shalt.err (!%p829_p6)
}
  0x26   : > { %s965_s15 = smov 64   ;;  %s966_s16 = smov 4  }
  0x27   : > { %729 = dma.hbm_to_vmem [thread:$0]  (!%p1052_p11), %s1262_s1, 1024, %s1045_s28, [#allocation6], %s965_s15, %s965_s15, %s966_s16  }
  0x28   : > { %s833_s7 = scalar_lea.hbm %s1264_s3, 1024 }
  0x29   : > { %p834_p2 = scmp.ne.s32.totalorder %s1264_s3, %s833_s7  ;;  %p840_p10 = scmp.lt.u32.totalorder %s833_s7, %s1264_s3 }
  0x2b   : > { %p836_p1 = pnand %p834_p2, %p807_p13 }
  0x2d   : > { %p837_p6 = pneg %p836_p1 }
  0x2f   : > { %p842_p3 = pnand %p840_p10, %p837_p6 }
  0x31   : > { %845 = shalt.err (!%p842_p3)
}
  0x32   : > { %s846_s28 = scalar_lea.vmem %s1056_s6, 1024  ;;  %p854_p12 = scmp.lt.s32.totalorder %s1056_s6, %s1056_s6 }
  0x33   : > { %p847_p5 = scmp.ne.s32.totalorder %s1056_s6, %s846_s28  ;;  %p855_p0 = scmp.lt.s32.totalorder %s846_s28, %s846_s28 }
  0x35   : > { %p849_p7 = pnand %p847_p5, %p807_p13  ;;  %p856_p2 = por %p855_p0, %p854_p12 }
  0x37   : > { %p850_p9 = pneg %p849_p7 }
  0x39   : > { %p857_p1 = pnand %p856_p2, %p850_p9 }
  0x3b   : > { %860 = shalt.err (!%p857_p1)
}
  0x3c   : > { %732 = dma.hbm_to_vmem [thread:$0]  (!%p1052_p11), %s1264_s3, 1024, %s1056_s6, [#allocation6], %s965_s15, %s965_s15, %s966_s16  }
  0x3d   : > { %s1111_s14 = sadd.s32 1, %s961_s21   ;;  %s29_s29 = sadd.s32 1, %s957_s20 }
  0x3e   : > { %s26_s17 = ssub.s32 %s961_s21, %s1111_s14  ;;  %p36_p13 = scmp.ne.s32.totalorder %s957_s20, %s953_s19 }
  0x3f   : > { %p27_p6 = scmp.eq.s32.totalorder %s26_s17, 0  ;;  %p37_p10 = scmp.eq.s32.totalorder %s961_s21, 0 }
  0x40   : > { %p1274_p3 = scmp.eq.s32.totalorder %s1022_s22, 1  ;;  %p743_p7 = scmp.lt.s32.totalorder %s961_s21, 2 }
  0x41   : > { %s1127_s27 = scalar_select %p27_p6, %s957_s20, %s29_s29  }
  0x42   : > { %p1121_p5 = por %p1274_p3, %p36_p13  ;;  %p38_p9 = por %p37_p10, %p36_p13 }
  0x43   : > { %s208_s30 = sand.u32 1, %s957_s20   ;;  %s628_s6 = sshll.u32 %s961_s21, 7 }
  0x44   : > { %s1275_s23 = scalar_select %p1121_p5, 1, 0 }
  0x45   : > { %s627_s7 = sshll.u32 %s208_s30, 3  ;;  %s1134_s8 = scalar_lea.hbm %s1261_s0, %s628_s6 }
  0x46   : > { %s212_s9 = scalar_lea.vmem [#allocation2], %s627_s7  ;;  %p1138_p11 = pnand %p743_p7, %p38_p9 }
  0x47   : > { %s219_s10 = sshll.u32 %s212_s9, 4  ;;  %s209_s28 = scalar_lea.sflag [#allocation3], %s208_s30  ;;  %s1136_s10 = int_to_ptr.vmem [resolvable:$true] %s219_s10 }
  0x48   : > { %s861_s12 = scalar_lea.hbm %s1134_s8, 128  ;;  %p863_p0 = pneg %p1138_p11 }
  0x49   : > { %p862_p12 = scmp.ne.s32.totalorder %s1134_s8, %s861_s12  ;;  %s866_s17 = scalar_lea.hbm %s1261_s0, 256 }
  0x4a   : > { %p867_p13 = scmp.lt.u32.totalorder %s1134_s8, %s1261_s0  ;;  %p868_p6 = scmp.lt.u32.totalorder %s866_s17, %s861_s12 }
  0x4b   : > { %p864_p2 = pnand %p863_p0, %p862_p12  ;;  %p870_p3 = scmp.lt.u32.totalorder %s861_s12, %s1134_s8 }
  0x4c   : > { %p869_p10 = por %p868_p6, %p867_p13 }
  0x4d   : > { %p865_p1 = pneg %p864_p2 }
  0x4e   : > { %p871_p7 = por %p870_p3, %p869_p10 }
  0x50   : > { %p872_p9 = pnand %p871_p7, %p865_p1 }
  0x52   : > { %875 = shalt.err (!%p872_p9)
}
  0x53   : > { %s876_s30 = scalar_lea.vmem %s1136_s10, 128  ;;  %s967_s15 = smov [#allocation2]  }
  0x54   : > { %p877_p12 = scmp.ne.s32.totalorder %s1136_s10, %s876_s30  ;;  %s881_s16 = sshll.u32 %s967_s15, 4  ;;  %s882_s16 = int_to_ptr.vmem [resolvable:$false] %s881_s16 }
  0x55   : > { %s883_s9 = scalar_lea.vmem %s882_s16, 256  ;;  %p884_p4 = scmp.lt.s32.totalorder %s1136_s10, %s882_s16 }
  0x56   : > { %p879_p2 = pnand %p877_p12, %p863_p0  ;;  %p885_p13 = scmp.lt.s32.totalorder %s883_s9, %s876_s30 }
  0x58   : > { %p880_p5 = pneg %p879_p2  ;;  %p886_p6 = por %p885_p13, %p884_p4 }
  0x5a   : > { %p887_p10 = pnand %p886_p6, %p880_p5 }
  0x5c   : > { %890 = shalt.err (!%p887_p10)
}
  0x5d   : > { %736 = dma.hbm_to_vmem [thread:$0]  (!%p1138_p11), %s1134_s8, 128, %s1136_s10, %s209_s28  }
  0x5e   : > { %228 = sbr.rel (%p1041_p8) target bundleno = 775 (0x307), region = 40  ;;  %s1170_s12 = sand.u32 (!%p1041_p8), 1, %s953_s19  }
  0x5f   : > { %s630_s13 = sshll.u32 (!%p1041_p8), %s1170_s12, 3  ;;  %s231_s29 = scalar_lea.sflag (!%p1041_p8), [#allocation3], %s1170_s12 }
  0x60   : > { %s1176_s17 = scalar_lea.vmem (!%p1041_p8), [#allocation2], %s630_s13  ;;  %p1277_p4 = scmp.ne.s32.totalorder (!%p1041_p8), %s1270_s24, 0 }
  0x65   : > { %936 = dma.done.wait (%p1277_p4), %s231_s29, 128  }
  0x66   : > { %938 = vsyncadd (%p1277_p4), %s231_s29, 4294967168  ;;  %p1278_p5 = scmp.eq.s32.totalorder %s1022_s22, 0 }
  0x68   : > { %940 = dma.done.wait (%p1278_p5), [#allocation6], 2048   ;;  %p1279_p8 = pmov %p1278_p5 }
  0x69   : > { %v968_v0 = vmov 0.0   ;;  %vm969_vm0 = vmmov 0   ;;  %v785_v1 = vld [vmem:[#allocation5] sm:$0xff]   ;;  %v786_v2 = vld [vmem:[#allocation5 + $0x8] sm:$0xff]   ;;  %v787_v3 = vld [vmem:[#allocation5 + $0x10] sm:$0xff]   ;;  %s653_s11 = sshll.u32 %s1022_s22, 7 }
  0x6a   : > { %942 = vsyncadd (%p1279_p8), [#allocation6], 4294965248  ;;  %674 = vmatprep.subr.bf16.mxu0 %v968_v0  ;;  %690 = vmatprep.mubr.msk.bf16.mxu0 %vm969_vm0, %v968_v0  ;;  %v788_v4 = vld [vmem:[#allocation5 + $0x18] sm:$0xff]   ;;  %v789_v5 = vld [vmem:[#allocation5 + $0x20] sm:$0xff]   ;;  %s268_s28 = scalar_lea.vmem [#allocation8], %s630_s13  ;;  %s1217_s15 = scalar_lea.hbm %s1266_s5, %s653_s11 }
  0x6b   : > { %694 = vmatprep.subr.bf16.mxu1 %v968_v0  ;;  %710 = vmatprep.mubr.msk.bf16.mxu1 %vm969_vm0, %v968_v0  ;;  %v790_v6 = vld [vmem:[#allocation5 + $0x28] sm:$0xff]   ;;  %v791_v7 = vld [vmem:[#allocation5 + $0x30] sm:$0xff]   ;;  %v792_v8 = vld [vmem:[#allocation5 + $0x38] sm:$0xff]   ;;  %s533_s7 = sshll.u32 %s268_s28, 4  ;;  %s520_s22 = scalar_lea.sflag [#allocation4], %s1170_s12  ;;  %s1219_s7 = int_to_ptr.vmem [resolvable:$true] %s533_s7 }
  0x6c   : > { %675 = vmatpush3.bf16.msra.mxu0 %v785_v1  ;;  %v270_v9 = vld [vmem:[%s1176_s17] sm:$0xff]  ;;  %v793_v11 = vld [vmem:[#allocation7] sm:$0xff]   ;;  %v794_v28 = vld [vmem:[#allocation7 + $0x8] sm:$0xff]   ;;  %s891_s16 = scalar_lea.vmem %s1219_s7, 128  ;;  %p1280_p0 = scmp.ne.s32.totalorder %s1275_s23, 0 }
  0x6d   : > { %676 = vmatprep.subr.bf16.mxu0 %v968_v0  ;;  %v271_v10 = vpack.c.bf16 %v270_v9, %v270_v9  ;;  %695 = vmatpush3.bf16.msra.mxu1 %v793_v11  ;;  %v634_v12 = vld [vmem:[%s1263_s2] ss:$0 sm:$0xff]  ;;  %v796_v30 = vld [vmem:[#allocation7 + $0x18] sm:$0xff]   ;;  %v797_v31 = vld [vmem:[#allocation7 + $0x20] sm:$0xff]   ;;  %p892_p11 = scmp.ne.s32.totalorder %s1219_s7, %s891_s16  ;;  %s970_s9 = smov [#allocation8]  }
  0x6e   : > { %696 = vmatprep.subr.bf16.mxu1 %v968_v0  ;;  %v795_v29 = vld [vmem:[#allocation7 + $0x10] sm:$0xff]   ;;  %v798_v32 = vld [vmem:[#allocation7 + $0x28] sm:$0xff]   ;;  %v800_v34 = vld [vmem:[#allocation7 + $0x38] sm:$0xff]   ;;  %s895_s13 = sshll.u32 %s970_s9, 4  ;;  %s896_s13 = int_to_ptr.vmem [resolvable:$false] %s895_s13 }
  0x6f   : > { %v799_v33 = vld [vmem:[#allocation7 + $0x30] sm:$0xff]   ;;  %p893_p1 = pnand %p892_p11, %p1280_p0  ;;  %s897_s29 = scalar_lea.vmem %s896_s13, 256 }
  0x70   : > { %677 = vmatpush3.bf16.msra.mxu0 %v786_v2  ;;  %v643_v47 = vld [vmem:[%s1265_s4] ss:$0 sm:$0xff]  ;;  %p898_p7 = scmp.lt.s32.totalorder %s1219_s7, %s896_s13  ;;  %p899_p9 = scmp.lt.s32.totalorder %s897_s29, %s891_s16 }
  0x71   : > { %678 = vmatprep.subr.bf16.mxu0 %v968_v0  ;;  %697 = vmatpush3.bf16.msra.mxu1 %v794_v28  ;;  %p894_p3 = pneg %p893_p1 }
  0x72   : > { %698 = vmatprep.subr.bf16.mxu1 %v968_v0  ;;  %p900_p12 = por %p899_p9, %p898_p7 }
  0x74   : > { %679 = vmatpush3.bf16.msra.mxu0 %v787_v3  ;;  %p901_p2 = pnand %p900_p12, %p894_p3 }
  0x75   : > { %680 = vmatprep.subr.bf16.mxu0 %v968_v0  ;;  %699 = vmatpush3.bf16.msra.mxu1 %v795_v29 }
  0x76   : > { %700 = vmatprep.subr.bf16.mxu1 %v968_v0 }
  0x78   : > { %681 = vmatpush3.bf16.msra.mxu0 %v788_v4 }
  0x79   : > { %682 = vmatprep.subr.bf16.mxu0 %v968_v0  ;;  %701 = vmatpush3.bf16.msra.mxu1 %v796_v30 }
  0x7a   : > { %702 = vmatprep.subr.bf16.mxu1 %v968_v0 }
  0x7c   : > { %683 = vmatpush3.bf16.msra.mxu0 %v789_v5 }
  0x7d   : > { %684 = vmatprep.subr.bf16.mxu0 %v968_v0  ;;  %703 = vmatpush3.bf16.msra.mxu1 %v797_v31 }
  0x7e   : > { %704 = vmatprep.subr.bf16.mxu1 %v968_v0 }
  0x80   : > { %685 = vmatpush3.bf16.msra.mxu0 %v790_v6 }
  0x81   : > { %686 = vmatprep.subr.bf16.mxu0 %v968_v0  ;;  %705 = vmatpush3.bf16.msra.mxu1 %v798_v32 }
  0x82   : > { %706 = vmatprep.subr.bf16.mxu1 %v968_v0 }
  0x84   : > { %687 = vmatpush3.bf16.msra.mxu0 %v791_v7 }
  0x85   : > { %688 = vmatprep.subr.bf16.mxu0 %v968_v0  ;;  %707 = vmatpush3.bf16.msra.mxu1 %v799_v33 }
  0x86   : > { %708 = vmatprep.subr.bf16.mxu1 %v968_v0 }
  0x88   : > { %689 = vmatpush3.bf16.msra.mxu0 %v792_v8 }
  0x89   : > { %709 = vmatpush3.bf16.msra.mxu1 %v800_v34 }
  0x8b   : > { %691 = vmatmul.mubr.bf16.vlgmr.msra.gmra.mrb[0].mxu0 %v271_v10 }
 0x15e   : > { %v377_v13 = vpop.f32.mrb[0].mxu0 }
 0x15f   : > { %v378_v14 = vadd.f32 %v634_v12, %v377_v13  ;;  %v692_v15 = vpop.f32.mrb[1].mxu0 }
 0x160   : > { %v380_v16 = vpop.f32.mrb[2].mxu0 }
 0x161   : > { %v384_v17 = vmul.f32 0.044715, %v378_v14  ;;  %v693_v18 = vpop.f32.mrb[3].mxu0  ;;  %v383_v24 = vmul.f32 0.5, %v378_v14 }
 0x163   : > { %v385_v19 = vmul.f32 %v384_v17, %v378_v14 }
 0x165   : > { %v386_v20 = vmul.f32 %v385_v19, %v378_v14 }
 0x167   : > { %v387_v21 = vadd.f32 %v386_v20, %v378_v14 }
 0x169   : > { %v388_v22 = vmul.f32 0.7978846, %v387_v21 }
 0x16b   : > { %801 = vtanh.f32 %v388_v22 }
 0x175   : > { %v802_v23 = vpop.eup %801 }
 0x176   : > { %v390_v25 = vadd.f32 1.0, %v802_v23 }
 0x178   : > { %v391_v26 = vmul.f32 %v390_v25, %v383_v24 }
 0x17a   : > { %392 = vadd.xlane.f32.xlu0 %v391_v26  ;;  %v395_v27 = vmul.f32 %v391_v26, %v391_v26 }
 0x17e   : > { %396 = vadd.xlane.f32.xlu0 %v395_v27 }
 0x207   : > { %v393_v35 = vpop.xlane.xlu0 %392 }
 0x208   : > { %v394_v36 = vmul.f32 0.015625, %v393_v35 }
 0x20a   : > { %v399_v38 = vmul.f32 %v394_v36, %v394_v36  ;;  %v404_v43 = vsub.f32 %v391_v26, %v394_v36 }
 0x20b   : > { %v397_v37 = vpop.xlane.xlu0 %396 }
 0x20c   : > { %v398_v39 = vmul.f32 0.015625, %v397_v37 }
 0x20e   : > { %v400_v40 = vsub.f32 %v398_v39, %v399_v38 }
 0x210   : > { %v401_v41 = vmax.f32 %v400_v40, 0.0 }
 0x212   : > { %v402_v42 = vadd.f32 1e-05, %v401_v41 }
 0x214   : > { %803 = vrsqrt.f32 %v402_v42 }
 0x21e   : > { %v804_v44 = vpop.eup %803 }
 0x21f   : > { %v405_v45 = vmul.f32 %v804_v44, %v404_v43 }
 0x221   : > { %v406_v46 = vpack.c.bf16 %v405_v45, %v405_v45 }
 0x223   : > { %711 = vmatmul.mubr.bf16.vlgmr.msra.gmra.mrb[0].mxu1 %v406_v46 }
 0x2f6   : > { %v512_v48 = vpop.f32.mrb[0].mxu1 }
 0x2f7   : > { %v513_v49 = vadd.f32 %v643_v47, %v512_v48  ;;  %v712_v50 = vpop.f32.mrb[1].mxu1 }
 0x2f8   : > { %v515_v51 = vpop.f32.mrb[2].mxu1 }
 0x2f9   : > { %518 = vst [vmem:[%s268_s28] sm:$0xff] %v513_v49  ;;  %v713_v52 = vpop.f32.mrb[3].mxu1 }
 0x2fa   : > { %904 = shalt.err (!%p901_p2)
}
 0x2fb   : > { %s905_s12 = scalar_lea.hbm %s1217_s15, 128  ;;  %s909_s26 = scalar_lea.hbm %s1266_s5, 256 }
 0x2fc   : > { %p906_p13 = scmp.ne.s32.totalorder %s1217_s15, %s905_s12  ;;  %p910_p4 = scmp.lt.u32.totalorder %s1217_s15, %s1266_s5 }
 0x2fd   : > { %p911_p5 = scmp.lt.u32.totalorder %s909_s26, %s905_s12  ;;  %p913_p11 = scmp.lt.u32.totalorder %s905_s12, %s1217_s15 }
 0x2fe   : > { %p907_p6 = pnand %p906_p13, %p1280_p0 }
 0x2ff   : > { %p912_p8 = por %p911_p5, %p910_p4 }
 0x300   : > { %p908_p10 = pneg %p907_p6 }
 0x301   : > { %p914_p1 = por %p913_p11, %p912_p8 }
 0x303   : > { %p915_p3 = pnand %p914_p1, %p908_p10 }
 0x305   : > { %918 = shalt.err (!%p915_p3)
}
 0x306   : > { %724 = dma.vmem_to_hbm [thread:$0]  (%p1280_p0), %s1219_s7, 128, %s1217_s15, %s520_s22  }
 0x307 PF: > { %s545_s11 = sand.u32 1, %s949_s18   ;;  %p1281_p7 = scmp.ne.s32.totalorder %s1271_s25, 0 }
 0x308   : > { %p1282_p9 = scmp.ge.s32.totalorder %s961_s21, 2  ;;  %s546_s28 = scalar_lea.sflag [#allocation4], %s545_s11 }
 0x30a   : > { %p738_p12 = pnand %p1282_p9, %p1281_p7 }
 0x30c   : > { %944 = dma.done.wait (!%p738_p12), %s546_s28, 128  }
 0x30d   : > { %946 = vsyncadd (!%p738_p12), %s546_s28, 4294967168  ;;  %p19_p2 = scmp.ge.s32.totalorder %s1111_s14, 4   ;;  %s1283_s18 = smov %s953_s19 }
 0x30e   : > { %s1284_s19 = smov %s957_s20  ;;  %s1285_s20 = smov %s1127_s27 }
 0x30f   : > { %s1286_s21 = smov %s1111_s14  ;;  %21 = sbr.rel (!%p19_p2) target bundleno = 6 (0x6), region = 93 }
 0x316   :  { %551 = vsyncpa [#allocation3], 1 }
 0x317   :  { %553 = vsyncpa [#allocation3 + $0x1], 1 }
 0x318   :  { %554 = vsyncpa [#allocation6], 1 }
 0x319   :  { %555 = vsyncpa [#allocation4], 1 }
 0x31a   :  { %557 = vsyncpa [#allocation4 + $0x1], 1 }

</bundles_post_ra>
